<compile_context>
chip_gen: v6e
topology: v6e:2x2x1
jax: 0.10.0
libtpu: 0.0.40
codegen_flags: <defaults>
</compile_context>

<pallas_src>
import jax
import jax.numpy as jnp
from jax.experimental import pallas as pl
from jax.experimental.pallas import tpu as pltpu

_LANES = 128
_SUBLANES = 8
_TILE_BYTES_TARGET = 1 << 20  # ~1 MiB per tile


def _copy_kernel(x_ref, o_ref):
    # Pure same-shape copy; the unsqueeze itself happens as a free reshape in
    # the wrapper (never inside the kernel -> no VMEM relayout).
    o_ref[...] = x_ref[...]


def _pick_2d_layout(n):
    """Largest lane-dense column count (multiple of 128) that divides n."""
    for cols in (1024, 512, 256, 128):
        if n % cols == 0:
            return n // cols, cols
    return None


def unsqueeze_pallas(x: jax.Array, idx: int) -> jax.Array:
    """Equivalent of torch.unsqueeze(x, idx); data moved by a Pallas copy kernel."""
    ndim = x.ndim
    # torch.unsqueeze accepts idx in [-(ndim+1), ndim]
    if idx < 0:
        idx = idx + ndim + 1
    assert 0 <= idx <= ndim, "unsqueeze index out of range"
    out_shape = x.shape[:idx] + (1,) + x.shape[idx:]

    n = x.size
    if n == 0:
        return jnp.reshape(x, out_shape)  # metadata-only

    layout = _pick_2d_layout(n)
    if layout is None:
        # Fallback: total size is not a multiple of 128 lanes. Single flat
        # 1-D full-array copy with identical in/out specs (still no reshape
        # inside the kernel).
        # TODO(synk): pad-to-128 + tiled path for large non-128-multiple sizes.
        x1d = jnp.reshape(x, (n,))
        y1d = pl.pallas_call(
            _copy_kernel,
            out_shape=jax.ShapeDtypeStruct((n,), x.dtype),
            in_specs=[pl.BlockSpec((n,), lambda: (0,))],
            out_specs=pl.BlockSpec((n,), lambda: (0,)),
            grid=(),
        )(x1d)
        return jnp.reshape(y1d, out_shape)

    rows, cols = layout
    x2d = jnp.reshape(x, (rows, cols))  # wrapper-side layout plumbing (free)

    # Tile rows: multiple of 8 sublanes, ~1 MiB per tile, never above `rows`.
    itemsize = jnp.dtype(x.dtype).itemsize
    tile_rows = (_TILE_BYTES_TARGET // (cols * itemsize)) // _SUBLANES * _SUBLANES
    tile_rows = min(rows, max(_SUBLANES, tile_rows))
    grid = (pl.cdiv(rows, tile_rows),)

    y2d = pl.pallas_call(
        _copy_kernel,
        out_shape=jax.ShapeDtypeStruct((rows, cols), x.dtype),
        grid=grid,
        in_specs=[pl.BlockSpec((tile_rows, cols), lambda i: (i, 0))],
        out_specs=pl.BlockSpec((tile_rows, cols), lambda i: (i, 0)),
        compiler_params=pltpu.CompilerParams(
            # Independent tiles: shard the copy across both v7x TensorCores.
            dimension_semantics=("parallel",),
        ),
    )(x2d)

    # Insert the size-1 axis host-side: pure metadata, zero data movement.
    return jnp.reshape(y2d, out_shape)


if __name__ == "__main__":
    key = jax.random.PRNGKey(0)
    # Small NCHW-style input consistent with the module's generic forward.
    x = jax.random.normal(key, (2, 4, 16, 16), dtype=jnp.float32)

    idx = 1  # the module's constructor argument
    y = unsqueeze_pallas(x, idx)
    y = jax.block_until_ready(y)

    # Verify against the pure-JAX reference (same semantics as torch.unsqueeze).
    y_ref = jnp.expand_dims(x, idx)
    assert y.shape == (2, 1, 4, 16, 16), y.shape
    assert y.dtype == x.dtype
    assert jnp.array_equal(y, y_ref)

    # Also exercise other insert positions (front, negative, idx == ndim) —
    # the inserted axis never reaches the kernel's BlockSpecs.
    for j in (0, -1, x.ndim):
        yj = jax.block_until_ready(unsqueeze_pallas(x, j))
        assert jnp.array_equal(yj, jnp.expand_dims(x, j))

    print("KERNEL_OK")
</pallas_src>

<mosaic_0001>
module attributes {stable_mosaic.version = 11 : i64} {
  func.func @_copy_kernel(%arg0: i32, %arg1: memref<2x1024xf32, #tpu.memory_space<vmem>>, %arg2: memref<2x1024xf32, #tpu.memory_space<vmem>>) attributes {dimension_semantics = [#tpu.dimension_semantics<parallel>], iteration_bounds = array<i64: 1>, scalar_prefetch = 0 : i64, scratch_operands = 0 : i64, tpu.core_type = #tpu.core_type<tc>, window_params = [{transform_indices = @transform_0, window_bounds = array<i64: 2, 1024>}, {transform_indices = @transform_1, window_bounds = array<i64: 2, 1024>}]} {
    %c0 = arith.constant 0 : index
    %c0_0 = arith.constant 0 : index
    %0 = vector.load %arg1[%c0, %c0_0] : memref<2x1024xf32, #tpu.memory_space<vmem>>, vector<2x1024xf32>
    %c0_1 = arith.constant 0 : index
    %c0_2 = arith.constant 0 : index
    %1 = vector.load %arg2[%c0_1, %c0_2] : memref<2x1024xf32, #tpu.memory_space<vmem>>, vector<2x1024xf32>
    tpu.vector_store %arg2[%c0_1, %c0_2], %0 {strides = array<i32>} : memref<2x1024xf32, #tpu.memory_space<vmem>>, vector<2x1024xf32>,
    return
  }
  func.func @transform_0(%arg0: i32) -> (i32, i32) {
    %c0_i32 = arith.constant 0 : i32
    %c0_i32_0 = arith.constant 0 : i32
    return %arg0, %c0_i32 : i32, i32
  }
  func.func @transform_1(%arg0: i32) -> (i32, i32) {
    %c0_i32 = arith.constant 0 : i32
    %c0_i32_0 = arith.constant 0 : i32
    return %arg0, %c0_i32 : i32, i32
  }
}

</mosaic_0001>

<bundles_post_ra>
// kernel: tpu_custom_call.1
= control target key start
LH: loop header
LB: loop body
LE: loop exit
PB: predicated region body
PF: predicated region fallthrough
CT: control target
= control target key end

     0   :  { %6 = vsyncpa [#allocation3], 0  ;;  %s104_s0 = inlined_call_operand.hbm [shape: f32[2,1024], index: 0, kind: input, shape index: {}]   ;;  %s105_s1 = inlined_call_operand.hbm [shape: f32[2,1024], index: 1, kind: output, shape index: {}]  }
   0x1   :  { %7 = vsyncpa [#allocation4], 0  ;;  %s86_s6 = smov [#allocation2]  }
   0x2   :  { %s14_s7 = sshll.u32 %s86_s6, 4  ;;  %s15_s7 = int_to_ptr.vmem [resolvable:$true] %s14_s7 }
   0x3   :  { %s50_s8 = scalar_lea.vmem %s15_s7, 256  ;;  %p55_p1 = scmp.lt.s32.totalorder %s15_s7, %s15_s7 }
   0x4   :  { %p51_p0 = scmp.ne.s32.totalorder %s15_s7, %s50_s8  ;;  %p56_p2 = scmp.lt.s32.totalorder %s50_s8, %s50_s8 }
   0x6   :  { %p57_p3 = por %p56_p2, %p55_p1 }
   0x8   :  { %p58_p4 = pnand %p57_p3, %p51_p0 }
   0xa   :  { %61 = shalt.err (!%p58_p4)
}
   0xb   :  { %17 = dma.hbm_to_vmem [thread:$0]  %s104_s0, 256, %s15_s7, [#allocation3]  }
   0xc   :  { %82 = dma.done.wait [#allocation3], 256  }
   0xd   :  { %83 = vsyncadd [#allocation3], 4294967040  ;;  %s87_s11 = smov [#allocation5]   ;;  %v21_v0 = vld [vmem:[#allocation2] sm:$0xff]  ;;  %v22_v1 = vld [vmem:[#allocation2 + $0x8] sm:$0xff] }
   0xe   :  { %s31_s12 = sshll.u32 %s87_s11, 4  ;;  %23 = vst [vmem:[#allocation5] sm:$0xff] %v21_v0  ;;  %24 = vst [vmem:[#allocation5 + $0x8] sm:$0xff] %v22_v1  ;;  %s32_s12 = int_to_ptr.vmem [resolvable:$true] %s31_s12 }
   0xf   :  { %s62_s13 = scalar_lea.vmem %s32_s12, 256  ;;  %p67_p6 = scmp.lt.s32.totalorder %s32_s12, %s32_s12 }
  0x10   :  { %p63_p5 = scmp.ne.s32.totalorder %s32_s12, %s62_s13  ;;  %p68_p7 = scmp.lt.s32.totalorder %s62_s13, %s62_s13 }
  0x12   :  { %p69_p8 = por %p68_p7, %p67_p6 }
  0x14   :  { %p70_p9 = pnand %p69_p8, %p63_p5 }
  0x16   :  { %73 = shalt.err (!%p70_p9)
}
  0x17   :  { %34 = dma.vmem_to_hbm [thread:$0]  %s32_s12, 256, %s105_s1, [#allocation4]  }
  0x18   :  { %84 = dma.done.wait [#allocation4], 256  }
  0x19   :  { %85 = vsyncadd [#allocation4], 4294967040 }
  0x1a   :  { %38 = vsyncpa [#allocation3], 1 }
  0x1b   :  { %39 = vsyncpa [#allocation4], 1 }

</bundles_post_ra>
